<compile_context>
chip_gen: v6e
topology: v6e:2x2x1
jax: 0.10.0
libtpu: 0.0.40
codegen_flags: <defaults>
</compile_context>

<pallas_src>
import jax
import jax.numpy as jnp
from jax.experimental import pallas as pl
from jax.experimental.pallas import tpu as pltpu


def ca_block_kernel(x_ref, w1_ref, wh_ref, ww_ref, pm_ref, eh_ref, ew_ref, o_ref):
    """One grid step processes a (Bn, C, HWp) slab of samples.

    x_ref : (Bn, C, HWp)   input (lane axis = padded H*W, lane-dense)
    w1_ref: (Cm, C)        conv_1x1 weight
    wh_ref: (C, Cm)        F_h weight          ww_ref: (C, Cm)  F_w weight
    pm_ref: (HWp, H+W)     fused pooling matrix (mean over W | mean over H)
    eh_ref: (H, HWp)       0/1 expansion matrix (broadcast s_h over W)
    ew_ref: (W, HWp)       0/1 expansion matrix (broadcast s_w over H)
    o_ref : (Bn, C, HWp)   output
    """
    bn, C, HWp = x_ref.shape
    H = eh_ref.shape[0]
    W = ew_ref.shape[0]
    Cm = w1_ref.shape[0]

    xb = x_ref[...]                                     # (Bn, C, HWp) in I/O dtype
    x2 = xb.reshape(bn * C, HWp)                        # free merge (C % 8/16 == 0)

    # ---- Pooling: one slab-wide MXU matmul against the fused averaging matrix.
    pool = jnp.dot(x2, pm_ref[...],
                   preferred_element_type=jnp.float32)              # (Bn*C, H+W)
    pool = pool.reshape(bn, C, H + W)

    # ---- Shared 1x1 conv (C -> Cm) + ReLU on the concatenated pool, batched
    # over the slab (tiny channel matmuls; broadcast weight once, hoisted).
    w1b = jnp.broadcast_to(w1_ref[...].astype(jnp.float32), (bn, Cm, C))
    y = jnp.maximum(
        jnp.einsum('bmc,bcl->bml', w1b, pool,
                   preferred_element_type=jnp.float32), 0.0)        # (Bn, Cm, H+W)

    # ---- F_h / F_w (Cm -> C) + sigmoid on the split halves.
    whb = jnp.broadcast_to(wh_ref[...].astype(jnp.float32), (bn, C, Cm))
    wwb = jnp.broadcast_to(ww_ref[...].astype(jnp.float32), (bn, C, Cm))
    s_h = jax.nn.sigmoid(
        jnp.einsum('bcm,bmh->bch', whb, y[:, :, :H],
                   preferred_element_type=jnp.float32))             # (Bn, C, H)
    s_w = jax.nn.sigmoid(
        jnp.einsum('bcm,bmw->bcw', wwb, y[:, :, H:],
                   preferred_element_type=jnp.float32))             # (Bn, C, W)

    # ---- Broadcast back to the lane-dense (Bn*C, HWp) layout with slab-wide
    # 0/1 expansion matmuls, form the rank-1 scale and multiply.
    cdt = pm_ref.dtype
    exp_h = jnp.dot(s_h.reshape(bn * C, H).astype(cdt), eh_ref[...],
                    preferred_element_type=jnp.float32)              # (Bn*C, HWp)
    exp_w = jnp.dot(s_w.reshape(bn * C, W).astype(cdt), ew_ref[...],
                    preferred_element_type=jnp.float32)              # (Bn*C, HWp)
    scale = exp_h * exp_w

    if o_ref.dtype == jnp.float32:
        out = x2.astype(jnp.float32) * scale                 # f32 tail (v5e-safe)
    else:
        out = x2 * scale.astype(x2.dtype)                    # bf16 tail (v6e/v7x)
    o_ref[...] = out.astype(o_ref.dtype).reshape(bn, C, HWp)


def _tpu_memory_params():
    """(scoped VMEM clamp, per-block DMA size target) per TPU generation."""
    phys = 64 * 1024 * 1024                       # conservative default (v7x)
    try:
        info = pltpu.get_tpu_info()
        phys = int(getattr(info, "vmem_capacity_bytes", phys))
    except Exception:
        pass
    if phys >= 100 * 1024 * 1024:                 # v5e / v6e: 128 MiB physical
        return 96 * 1024 * 1024, 24 * 1024 * 1024
    return 44 * 1024 * 1024, 6 * 1024 * 1024      # v7x: 64 MiB physical


def _choose_block_n(n, per_dma_bytes, tail_f32_bytes, scoped_limit_bytes,
                    target_block_bytes):
    """Largest divisor of n fitting VMEM, preferring >=4-8 even grid steps."""
    # VMEM per unit of block_n: in+out blocks (double-buffered) + f32 temporaries
    # of the batched expansion / multiply tail.
    per_bn = 4 * per_dma_bytes + tail_f32_bytes
    cap = max(1, int(scoped_limit_bytes * 0.7) // per_bn)
    # Keep several grid steps so i+1 prefetch / i-1 writeback hide behind compute
    # and both TensorCores get balanced work, while blocks stay above target size.
    for steps in (8, 4, 2):
        if n >= steps and (n // steps) * per_dma_bytes >= target_block_bytes:
            cap = min(cap, n // steps)
            break
    cap = max(1, min(cap, n))
    bn = 1
    for d in range(1, cap + 1):
        if n % d == 0:
            bn = d
    return bn


def ca_block(x, w1, wh, ww, *, block_n=None):
    N, C, H, W = x.shape
    Cm = w1.shape[0]
    HW = H * W
    dtype = x.dtype
    itemsize = jnp.dtype(dtype).itemsize

    # Free reshape + sublane-friendly channel count (required for the in-kernel
    # (Bn, C, HW) <-> (Bn*C, HW) flatten to be a no-op relayout).
    sub = 16 if itemsize == 2 else 8
    assert C % sub == 0, f"C={C} must be a multiple of {sub} for this kernel"

    # Lane-dense view; pad the lane axis to a multiple of 128 so all stores are
    # unmasked (zero pad rows/cols in the constant matrices keep the math exact).
    HWp = ((HW + 127) // 128) * 128
    x2 = x.reshape(N, C, HW)
    if HWp != HW:
        x2 = jnp.pad(x2, ((0, 0), (0, 0), (0, HWp - HW)))

    # Constant matrices (resident in VMEM across the grid).
    s_idx = jnp.arange(HW)
    h_of_s = s_idx // W
    w_of_s = s_idx % W
    pm = jnp.concatenate(
        [(h_of_s[:, None] == jnp.arange(H)[None, :]).astype(jnp.float32) / float(W),
         (w_of_s[:, None] == jnp.arange(W)[None, :]).astype(jnp.float32) / float(H)],
        axis=1)                                                       # (HW, H+W)
    eh = (jnp.arange(H)[:, None] == h_of_s[None, :]).astype(jnp.float32)  # (H, HW)
    ew = (jnp.arange(W)[:, None] == w_of_s[None, :]).astype(jnp.float32)  # (W, HW)
    if HWp != HW:
        pm = jnp.pad(pm, ((0, HWp - HW), (0, 0)))
        eh = jnp.pad(eh, ((0, 0), (0, HWp - HW)))
        ew = jnp.pad(ew, ((0, 0), (0, HWp - HW)))
    pm = pm.astype(dtype)
    eh = eh.astype(dtype)
    ew = ew.astype(dtype)

    per_dma = C * HWp * itemsize                 # one sample, input OR output
    tail_f32 = 3 * C * HWp * 4                   # exp_h / exp_w / scale+x_f32
    scoped_clamp, target_block_bytes = _tpu_memory_params()
    if block_n is None:
        block_n = _choose_block_n(N, per_dma, tail_f32, scoped_clamp,
                                  target_block_bytes)
    assert N % block_n == 0, "block_n must divide the batch"
    grid = (N // block_n,)

    # Explicit scoped-VMEM limit: blocks (double-buffered) + f32 temporaries +
    # constants + small channel intermediates, clamped per generation.
    const_bytes = 2 * HWp * (H + W) * itemsize + 3 * Cm * C * 4
    mid_bytes = 3 * block_n * (C + Cm) * (H + W) * 4
    est = 4 * block_n * per_dma + block_n * tail_f32 + mid_bytes + 2 * const_bytes
    vmem_limit = int(min(max(int(est * 1.3), 16 * 1024 * 1024), scoped_clamp))

    out2 = pl.pallas_call(
        ca_block_kernel,
        out_shape=jax.ShapeDtypeStruct((N, C, HWp), dtype),
        grid_spec=pltpu.PrefetchScalarGridSpec(
            num_scalar_prefetch=0,
            grid=grid,
            in_specs=[
                pl.BlockSpec((block_n, C, HWp), lambda n: (n, 0, 0)),
                pl.BlockSpec((Cm, C), lambda n: (0, 0)),
                pl.BlockSpec((C, Cm), lambda n: (0, 0)),
                pl.BlockSpec((C, Cm), lambda n: (0, 0)),
                pl.BlockSpec((HWp, H + W), lambda n: (0, 0)),
                pl.BlockSpec((H, HWp), lambda n: (0, 0)),
                pl.BlockSpec((W, HWp), lambda n: (0, 0)),
            ],
            out_specs=pl.BlockSpec((block_n, C, HWp), lambda n: (n, 0, 0)),
        ),
        compiler_params=pltpu.CompilerParams(
            dimension_semantics=("parallel",),
            vmem_limit_bytes=vmem_limit,
        ),
    )(x2, w1, wh, ww, pm, eh, ew)

    if HWp != HW:
        out2 = out2[:, :, :HW]
    return out2.reshape(N, C, H, W)


def ca_block_ref(x, w1, wh, ww):
    # Pure-JAX reference mirroring the PyTorch forward (NCHW).
    pool_h = jnp.mean(x, axis=3)                                  # (N, C, H)
    pool_w = jnp.mean(x, axis=2)                                  # (N, C, W)
    cat = jnp.concatenate([pool_h, pool_w], axis=2)               # (N, C, H+W)
    y = jax.nn.relu(jnp.einsum('mc,ncl->nml', w1, cat))           # (N, Cm, H+W)
    H = x.shape[2]
    y_h, y_w = y[:, :, :H], y[:, :, H:]
    s_h = jax.nn.sigmoid(jnp.einsum('cm,nmh->nch', wh, y_h))      # (N, C, H)
    s_w = jax.nn.sigmoid(jnp.einsum('cm,nmw->ncw', ww, y_w))      # (N, C, W)
    return x * s_h[:, :, :, None] * s_w[:, :, None, :]


if __name__ == "__main__":
    N, C, H, W = 2, 32, 16, 16
    reduction = 4
    Cm = C // reduction

    key = jax.random.PRNGKey(0)
    kx, k1, k2, k3 = jax.random.split(key, 4)
    x = jax.random.normal(kx, (N, C, H, W), dtype=jnp.float32)
    # 1x1-conv weights (kernel_size=1, no bias) as channel matrices.
    w1 = 0.1 * jax.random.normal(k1, (Cm, C), dtype=jnp.float32)   # conv_1x1
    wh = 0.1 * jax.random.normal(k2, (C, Cm), dtype=jnp.float32)   # F_h
    ww = 0.1 * jax.random.normal(k3, (C, Cm), dtype=jnp.float32)   # F_w

    # float32 I/O path.
    out = jax.block_until_ready(ca_block(x, w1, wh, ww))
    ref = ca_block_ref(x, w1, wh, ww)
    assert out.shape == (N, C, H, W)
    # Tolerance allows for the MXU's reduced-precision f32 matmul passes in the
    # pooling/expansion dots; real bugs produce O(0.1+) errors.
    assert jnp.allclose(out, ref, atol=1e-2, rtol=1e-2), "f32 mismatch vs reference"

    # bfloat16 I/O path (halves HBM traffic for this bandwidth-bound op).
    x_bf = x.astype(jnp.bfloat16)
    out_bf = jax.block_until_ready(ca_block(x_bf, w1, wh, ww))
    ref_bf = ca_block_ref(x_bf.astype(jnp.float32), w1, wh, ww)
    assert out_bf.dtype == jnp.bfloat16
    assert jnp.allclose(out_bf.astype(jnp.float32), ref_bf,
                        atol=5e-2, rtol=5e-2), "bf16 mismatch vs reference"

    print("KERNEL_OK")
</pallas_src>

<mosaic_0001>
module attributes {stable_mosaic.version = 11 : i64} {
  func.func @ca_block_kernel(%arg0: i32, %arg1: memref<2x32x256xf32, #tpu.memory_space<vmem>>, %arg2: memref<8x32xf32, #tpu.memory_space<vmem>>, %arg3: memref<32x8xf32, #tpu.memory_space<vmem>>, %arg4: memref<32x8xf32, #tpu.memory_space<vmem>>, %arg5: memref<256x32xf32, #tpu.memory_space<vmem>>, %arg6: memref<16x256xf32, #tpu.memory_space<vmem>>, %arg7: memref<16x256xf32, #tpu.memory_space<vmem>>, %arg8: memref<2x32x256xf32, #tpu.memory_space<vmem>>) attributes {dimension_semantics = [#tpu.dimension_semantics<parallel>], iteration_bounds = array<i64: 1>, scalar_prefetch = 0 : i64, scratch_operands = 0 : i64, tpu.core_type = #tpu.core_type<tc>, window_params = [{transform_indices = @transform_0, window_bounds = array<i64: 2, 32, 256>}, {pipeline_mode = #tpu.pipeline_mode<synchronous>, transform_indices = @transform_1, window_bounds = array<i64: 8, 32>}, {pipeline_mode = #tpu.pipeline_mode<synchronous>, transform_indices = @transform_2, window_bounds = array<i64: 32, 8>}, {pipeline_mode = #tpu.pipeline_mode<synchronous>, transform_indices = @transform_3, window_bounds = array<i64: 32, 8>}, {pipeline_mode = #tpu.pipeline_mode<synchronous>, transform_indices = @transform_4, window_bounds = array<i64: 256, 32>}, {pipeline_mode = #tpu.pipeline_mode<synchronous>, transform_indices = @transform_5, window_bounds = array<i64: 16, 256>}, {pipeline_mode = #tpu.pipeline_mode<synchronous>, transform_indices = @transform_6, window_bounds = array<i64: 16, 256>}, {transform_indices = @transform_7, window_bounds = array<i64: 2, 32, 256>}]} {
    %c0 = arith.constant 0 : index
    %c0_0 = arith.constant 0 : index
    %c0_1 = arith.constant 0 : index
    %0 = vector.load %arg1[%c0, %c0_0, %c0_1] : memref<2x32x256xf32, #tpu.memory_space<vmem>>, vector<2x32x256xf32>
    %1 = vector.shape_cast %0 : vector<2x32x256xf32> to vector<64x256xf32>
    %c0_2 = arith.constant 0 : index
    %c0_3 = arith.constant 0 : index
    %2 = vector.load %arg5[%c0_2, %c0_3] : memref<256x32xf32, #tpu.memory_space<vmem>>, vector<256x32xf32>
    %cst = arith.constant dense<0.000000e+00> : vector<64x32xf32>
    %3 = tpu.matmul %1, %2, %cst {dimension_numbers = #tpu.dot_dimension_numbers<[1], [0], [0], [1], [0, 0, 1, 1], [], []>} : vector<64x256xf32>, vector<256x32xf32>, vector<64x32xf32> -> vector<64x32xf32>
    %4 = vector.shape_cast %3 : vector<64x32xf32> to vector<2x32x32xf32>
    %c0_4 = arith.constant 0 : index
    %c0_5 = arith.constant 0 : index
    %5 = vector.load %arg2[%c0_4, %c0_5] : memref<8x32xf32, #tpu.memory_space<vmem>>, vector<8x32xf32>
    %6 = vector.shape_cast %5 : vector<8x32xf32> to vector<1x8x32xf32>
    %7 = vector.broadcast %6 : vector<1x8x32xf32> to vector<2x8x32xf32>
    "tpu.trace_start"() <{level = 10 : i32, message = "bmc,bcl->bml"}> : () -> ()
    %cst_6 = arith.constant dense<0.000000e+00> : vector<2x8x32xf32>
    %8 = tpu.matmul %7, %4, %cst_6 {dimension_numbers = #tpu.dot_dimension_numbers<[2], [1], [1], [2], [0, 0, 0, 1, 1, 2], [0], [0]>} : vector<2x8x32xf32>, vector<2x32x32xf32>, vector<2x8x32xf32> -> vector<2x8x32xf32>
    "tpu.trace_stop"() : () -> ()
    %cst_7 = arith.constant 0.000000e+00 : f32
    %9 = vector.broadcast %cst_7 : f32 to vector<2x8x32xf32>
    %10 = arith.maximumf %8, %9 : vector<2x8x32xf32>
    %c0_8 = arith.constant 0 : index
    %c0_9 = arith.constant 0 : index
    %11 = vector.load %arg3[%c0_8, %c0_9] : memref<32x8xf32, #tpu.memory_space<vmem>>, vector<32x8xf32>
    %12 = vector.shape_cast %11 : vector<32x8xf32> to vector<1x32x8xf32>
    %13 = vector.broadcast %12 : vector<1x32x8xf32> to vector<2x32x8xf32>
    %c0_10 = arith.constant 0 : index
    %c0_11 = arith.constant 0 : index
    %14 = vector.load %arg4[%c0_10, %c0_11] : memref<32x8xf32, #tpu.memory_space<vmem>>, vector<32x8xf32>
    %15 = vector.shape_cast %14 : vector<32x8xf32> to vector<1x32x8xf32>
    %16 = vector.broadcast %15 : vector<1x32x8xf32> to vector<2x32x8xf32>
    %17 = vector.extract_strided_slice %10 {offsets = [0, 0, 0], sizes = [2, 8, 16], strides = [1, 1, 1]} : vector<2x8x32xf32> to vector<2x8x16xf32>
    "tpu.trace_start"() <{level = 10 : i32, message = "bcm,bmh->bch"}> : () -> ()
    %cst_12 = arith.constant dense<0.000000e+00> : vector<2x32x16xf32>
    %18 = tpu.matmul %13, %17, %cst_12 {dimension_numbers = #tpu.dot_dimension_numbers<[2], [1], [1], [2], [0, 0, 0, 1, 1, 2], [0], [0]>} : vector<2x32x8xf32>, vector<2x8x16xf32>, vector<2x32x16xf32> -> vector<2x32x16xf32>
    "tpu.trace_stop"() : () -> ()
    %19 = arith.negf %18 : vector<2x32x16xf32>
    %20 = math.exp %19 : vector<2x32x16xf32>
    %cst_13 = arith.constant 1.000000e+00 : f32
    %21 = vector.broadcast %cst_13 : f32 to vector<2x32x16xf32>
    %22 = arith.addf %21, %20 : vector<2x32x16xf32>
    %23 = arith.divf %21, %22 : vector<2x32x16xf32>
    %24 = vector.extract_strided_slice %10 {offsets = [0, 0, 16], sizes = [2, 8, 16], strides = [1, 1, 1]} : vector<2x8x32xf32> to vector<2x8x16xf32>
    "tpu.trace_start"() <{level = 10 : i32, message = "bcm,bmw->bcw"}> : () -> ()
    %cst_14 = arith.constant dense<0.000000e+00> : vector<2x32x16xf32>
    %25 = tpu.matmul %16, %24, %cst_14 {dimension_numbers = #tpu.dot_dimension_numbers<[2], [1], [1], [2], [0, 0, 0, 1, 1, 2], [0], [0]>} : vector<2x32x8xf32>, vector<2x8x16xf32>, vector<2x32x16xf32> -> vector<2x32x16xf32>
    "tpu.trace_stop"() : () -> ()
    %26 = arith.negf %25 : vector<2x32x16xf32>
    %27 = math.exp %26 : vector<2x32x16xf32>
    %cst_15 = arith.constant 1.000000e+00 : f32
    %28 = vector.broadcast %cst_15 : f32 to vector<2x32x16xf32>
    %29 = arith.addf %28, %27 : vector<2x32x16xf32>
    %30 = arith.divf %28, %29 : vector<2x32x16xf32>
    %31 = vector.shape_cast %23 : vector<2x32x16xf32> to vector<64x16xf32>
    %c0_16 = arith.constant 0 : index
    %c0_17 = arith.constant 0 : index
    %32 = vector.load %arg6[%c0_16, %c0_17] : memref<16x256xf32, #tpu.memory_space<vmem>>, vector<16x256xf32>
    %cst_18 = arith.constant dense<0.000000e+00> : vector<64x256xf32>
    %33 = tpu.matmul %31, %32, %cst_18 {dimension_numbers = #tpu.dot_dimension_numbers<[1], [0], [0], [1], [0, 0, 1, 1], [], []>} : vector<64x16xf32>, vector<16x256xf32>, vector<64x256xf32> -> vector<64x256xf32>
    %34 = vector.shape_cast %30 : vector<2x32x16xf32> to vector<64x16xf32>
    %c0_19 = arith.constant 0 : index
    %c0_20 = arith.constant 0 : index
    %35 = vector.load %arg7[%c0_19, %c0_20] : memref<16x256xf32, #tpu.memory_space<vmem>>, vector<16x256xf32>
    %cst_21 = arith.constant dense<0.000000e+00> : vector<64x256xf32>
    %36 = tpu.matmul %34, %35, %cst_21 {dimension_numbers = #tpu.dot_dimension_numbers<[1], [0], [0], [1], [0, 0, 1, 1], [], []>} : vector<64x16xf32>, vector<16x256xf32>, vector<64x256xf32> -> vector<64x256xf32>
    %37 = arith.mulf %33, %36 : vector<64x256xf32>
    %38 = arith.mulf %1, %37 : vector<64x256xf32>
    %39 = vector.shape_cast %38 : vector<64x256xf32> to vector<2x32x256xf32>
    %c0_22 = arith.constant 0 : index
    %c0_23 = arith.constant 0 : index
    %c0_24 = arith.constant 0 : index
    %40 = vector.load %arg8[%c0_22, %c0_23, %c0_24] : memref<2x32x256xf32, #tpu.memory_space<vmem>>, vector<2x32x256xf32>
    tpu.vector_store %arg8[%c0_22, %c0_23, %c0_24], %39 {strides = array<i32>} : memref<2x32x256xf32, #tpu.memory_space<vmem>>, vector<2x32x256xf32>,
    return
  }
  func.func @transform_0(%arg0: i32) -> (i32, i32, i32) {
    %c0_i32 = arith.constant 0 : i32
    %c0_i32_0 = arith.constant 0 : i32
    %c0_i32_1 = arith.constant 0 : i32
    return %arg0, %c0_i32, %c0_i32_0 : i32, i32, i32
  }
  func.func @transform_1(%arg0: i32) -> (i32, i32) {
    %c0_i32 = arith.constant 0 : i32
    %c0_i32_0 = arith.constant 0 : i32
    %c0_i32_1 = arith.constant 0 : i32
    return %c0_i32, %c0_i32_0 : i32, i32
  }
  func.func @transform_2(%arg0: i32) -> (i32, i32) {
    %c0_i32 = arith.constant 0 : i32
    %c0_i32_0 = arith.constant 0 : i32
    %c0_i32_1 = arith.constant 0 : i32
    return %c0_i32, %c0_i32_0 : i32, i32
  }
  func.func @transform_3(%arg0: i32) -> (i32, i32) {
    %c0_i32 = arith.constant 0 : i32
    %c0_i32_0 = arith.constant 0 : i32
    %c0_i32_1 = arith.constant 0 : i32
    return %c0_i32, %c0_i32_0 : i32, i32
  }
  func.func @transform_4(%arg0: i32) -> (i32, i32) {
    %c0_i32 = arith.constant 0 : i32
    %c0_i32_0 = arith.constant 0 : i32
    %c0_i32_1 = arith.constant 0 : i32
    return %c0_i32, %c0_i32_0 : i32, i32
  }
  func.func @transform_5(%arg0: i32) -> (i32, i32) {
    %c0_i32 = arith.constant 0 : i32
    %c0_i32_0 = arith.constant 0 : i32
    %c0_i32_1 = arith.constant 0 : i32
    return %c0_i32, %c0_i32_0 : i32, i32
  }
  func.func @transform_6(%arg0: i32) -> (i32, i32) {
    %c0_i32 = arith.constant 0 : i32
    %c0_i32_0 = arith.constant 0 : i32
    %c0_i32_1 = arith.constant 0 : i32
    return %c0_i32, %c0_i32_0 : i32, i32
  }
  func.func @transform_7(%arg0: i32) -> (i32, i32, i32) {
    %c0_i32 = arith.constant 0 : i32
    %c0_i32_0 = arith.constant 0 : i32
    %c0_i32_1 = arith.constant 0 : i32
    return %arg0, %c0_i32, %c0_i32_0 : i32, i32, i32
  }
}

</mosaic_0001>

<bundles_post_ra>
// kernel: tpu_custom_call.1
= control target key start
LH: loop header
LB: loop body
LE: loop exit
PB: predicated region body
PF: predicated region fallthrough
CT: control target
= control target key end

     0   :  { %s1807_s0 = inlined_call_operand.vmem [shape: f32[2,32,256], index: 0, kind: input, shape index: {}]   ;;  %s1808_s1 = inlined_call_operand.vmem [shape: f32[8,32], index: 1, kind: input, shape index: {}]   ;;  %s1809_s2 = inlined_call_operand.vmem [shape: f32[32,8], index: 2, kind: input, shape index: {}]   ;;  %s1810_s3 = inlined_call_operand.vmem [shape: f32[32,8], index: 3, kind: input, shape index: {}]   ;;  %s1811_s4 = inlined_call_operand.vmem [shape: f32[256,32], index: 4, kind: input, shape index: {}]   ;;  %s1812_s5 = inlined_call_operand.vmem [shape: f32[16,256], index: 5, kind: input, shape index: {}]   ;;  %s1813_s6 = inlined_call_operand.vmem [shape: f32[16,256], index: 6, kind: input, shape index: {}]   ;;  %s1814_s7 = inlined_call_operand.hbm [shape: f32[2,32,256], index: 7, kind: output, shape index: {}]  }
   0x1   :  { %v74_v0 = vld [vmem:[%s1811_s4 + $0xf8] sm:$0xff]  ;;  %v73_v2 = vld [vmem:[%s1811_s4 + $0xf0] sm:$0xff]  ;;  %v72_v4 = vld [vmem:[%s1811_s4 + $0xe8] sm:$0xff] }
   0x2   :  { %v58_v1 = vld [vmem:[%s1811_s4 + $0x78] sm:$0xff]  ;;  %1201 = vmatprep.subr.mxu0 %v74_v0  ;;  %v57_v3 = vld [vmem:[%s1811_s4 + $0x70] sm:$0xff]  ;;  %v56_v5 = vld [vmem:[%s1811_s4 + $0x68] sm:$0xff] }
   0x3   :  { %1202 = vmatpush3.msra.mxu0 %v58_v1  ;;  %v71_v6 = vld [vmem:[%s1811_s4 + $0xe0] sm:$0xff]  ;;  %v70_v8 = vld [vmem:[%s1811_s4 + $0xd8] sm:$0xff]  ;;  %v69_v10 = vld [vmem:[%s1811_s4 + $0xd0] sm:$0xff] }
   0x4   :  { %1203 = vmatprep.subr.mxu0 %v73_v2  ;;  %v55_v7 = vld [vmem:[%s1811_s4 + $0x60] sm:$0xff]  ;;  %v54_v9 = vld [vmem:[%s1811_s4 + $0x58] sm:$0xff]  ;;  %v53_v11 = vld [vmem:[%s1811_s4 + $0x50] sm:$0xff] }
   0x5   :  { %1204 = vmatpush3.msra.mxu0 %v57_v3  ;;  %v68_v12 = vld [vmem:[%s1811_s4 + $0xc8] sm:$0xff]  ;;  %v67_v15 = vld [vmem:[%s1811_s4 + $0xc0] sm:$0xff]  ;;  %v66_v17 = vld [vmem:[%s1811_s4 + $0xb8] sm:$0xff] }
   0x6   :  { %1205 = vmatprep.subr.mxu0 %v72_v4  ;;  %v1525_v13 = vld [vmem:[%s1807_s0 + $0x8] sm:$0xff]  ;;  %v51_v16 = vld [vmem:[%s1811_s4 + $0x40] sm:$0xff]  ;;  %v50_v18 = vld [vmem:[%s1811_s4 + $0x38] sm:$0xff] }
   0x7   :  { %1206 = vmatpush3.msra.mxu0 %v56_v5  ;;  %v52_v14 = vld [vmem:[%s1811_s4 + $0x48] sm:$0xff]  ;;  %139 = vmatprep.mubr.f32.mxu0 %v1525_v13  ;;  %v65_v19 = vld [vmem:[%s1811_s4 + $0xb0] sm:$0xff] }
   0x8   :  { %1207 = vmatprep.subr.mxu0 %v71_v6 }
   0x9   :  { %1208 = vmatpush3.msra.mxu0 %v55_v7 }
   0xa   :  { %1209 = vmatprep.subr.mxu0 %v70_v8 }
   0xb   :  { %1210 = vmatpush3.msra.mxu0 %v54_v9 }
   0xc   :  { %1211 = vmatprep.subr.mxu0 %v69_v10 }
   0xd   :  { %1212 = vmatpush3.msra.mxu0 %v53_v11 }
   0xe   :  { %1213 = vmatprep.subr.mxu0 %v68_v12 }
   0xf   :  { %1214 = vmatpush3.msra.mxu0 %v52_v14 }
  0x10   :  { %1215 = vmatprep.subr.mxu0 %v67_v15 }
  0x11   :  { %1216 = vmatpush3.msra.mxu0 %v51_v16 }
  0x12   :  { %12 = vsyncpa [#allocation3], 0  ;;  %1217 = vmatprep.subr.mxu0 %v66_v17  ;;  %v49_v20 = vld [vmem:[%s1811_s4 + $0x30] sm:$0xff]  ;;  %v64_v21 = vld [vmem:[%s1811_s4 + $0xa8] sm:$0xff]  ;;  %v1437_v48 = vmov 0.0   ;;  %vm1438_vm0 = vmmov 0  }
  0x13   :  { %1218 = vmatpush3.msra.mxu0 %v50_v18  ;;  %v48_v22 = vld [vmem:[%s1811_s4 + $0x28] sm:$0xff]  ;;  %v63_v23 = vld [vmem:[%s1811_s4 + $0xa0] sm:$0xff]  ;;  %v62_v25 = vld [vmem:[%s1811_s4 + $0x98] sm:$0xff]  ;;  %1287 = vmatprep.subr.mxu1 %v1437_v48  ;;  %vm181_vm1 = vcmask 261120   ;;  %vm335_vm2 = vcmask 64512   ;;  %s1439_s30 = smov 112  }
  0x14   :  { %1219 = vmatprep.subr.mxu0 %v65_v19  ;;  %v47_v24 = vld [vmem:[%s1811_s4 + $0x20] sm:$0xff]  ;;  %v46_v26 = vld [vmem:[%s1811_s4 + $0x18] sm:$0xff]  ;;  %v61_v27 = vld [vmem:[%s1811_s4 + $0x90] sm:$0xff]  ;;  %1295 = vmatprep.mubr.msk.f32.mxu1 %vm1438_vm0, %v1437_v48  ;;  %vm808_vm3 = vcmask 130048  }
  0x15   :  { %1220 = vmatpush3.msra.mxu0 %v49_v20  ;;  %v45_v28 = vld [vmem:[%s1811_s4 + $0x10] sm:$0xff]  ;;  %v60_v29 = vld [vmem:[%s1811_s4 + $0x88] sm:$0xff]  ;;  %v59_v31 = vld [vmem:[%s1811_s4 + $0x80] sm:$0xff] }
  0x16   :  { %1221 = vmatprep.subr.mxu0 %v64_v21  ;;  %v44_v30 = vld [vmem:[%s1811_s4 + $0x8] sm:$0xff]  ;;  %v43_v32 = vld [vmem:[%s1811_s4] sm:$0xff]  ;;  %v1593_v34 = vld [vmem:[%s1807_s0 + $0x18] sm:$0xff] }
  0x17   :  { %1222 = vmatpush3.msra.mxu0 %v48_v22  ;;  %v1588_v33 = vld [vmem:[%s1807_s0] sm:$0xff]  ;;  %v1600_v35 = vld [vmem:[%s1807_s0 + $0x10] sm:$0xff]  ;;  %v1605_v36 = vld [vmem:[%s1807_s0 + $0x28] sm:$0xff] }
  0x18   :  { %1223 = vmatprep.subr.mxu0 %v63_v23  ;;  %v1612_v37 = vld [vmem:[%s1807_s0 + $0x20] sm:$0xff]  ;;  %v1617_v38 = vld [vmem:[%s1807_s0 + $0x38] sm:$0xff]  ;;  %v1624_v39 = vld [vmem:[%s1807_s0 + $0x30] sm:$0xff] }
  0x19   :  { %1224 = vmatpush3.msra.mxu0 %v47_v24  ;;  %v1629_v40 = vld [vmem:[%s1807_s0 + $0x48] sm:$0xff]  ;;  %v1636_v41 = vld [vmem:[%s1807_s0 + $0x40] sm:$0xff]  ;;  %v1641_v42 = vld [vmem:[%s1807_s0 + $0x58] sm:$0xff] }
  0x1a   :  { %1225 = vmatprep.subr.mxu0 %v62_v25  ;;  %v1648_v43 = vld [vmem:[%s1807_s0 + $0x50] sm:$0xff]  ;;  %v1653_v44 = vld [vmem:[%s1807_s0 + $0x68] sm:$0xff]  ;;  %v1660_v45 = vld [vmem:[%s1807_s0 + $0x60] sm:$0xff] }
  0x1b   :  { %1226 = vmatpush3.msra.mxu0 %v46_v26  ;;  %v1665_v46 = vld [vmem:[%s1807_s0 + $0x78] sm:$0xff]  ;;  %v1672_v47 = vld [vmem:[%s1807_s0 + $0x70] sm:$0xff]  ;;  %v180_v0 = vld [vmem:[%s1808_s1] sm:$0xff] }
  0x1c   :  { %1227 = vmatprep.subr.mxu0 %v61_v27  ;;  %v327_v10 = vld [vmem:[%s1809_s2] sm:$0xff]  ;;  %v328_v15 = vld [vmem:[%s1809_s2 + $0x8] sm:$0xff]  ;;  %v329_v16 = vld [vmem:[%s1809_s2 + $0x10] sm:$0xff] }
  0x1d   :  { %1228 = vmatpush3.msra.mxu0 %v45_v28  ;;  %v330_v17 = vld [vmem:[%s1809_s2 + $0x18] sm:$0xff]  ;;  %v331_v21 = vld [vmem:[%s1810_s3] sm:$0xff]  ;;  %v332_v23 = vld [vmem:[%s1810_s3 + $0x8] sm:$0xff] }
  0x1e   :  { %1229 = vmatprep.subr.mxu0 %v60_v29  ;;  %v333_v24 = vld [vmem:[%s1810_s3 + $0x10] sm:$0xff]  ;;  %v334_v25 = vld [vmem:[%s1810_s3 + $0x18] sm:$0xff]  ;;  %v805_v29 = vld [vmem:[%s1812_s5 + $0x8] sm:$0xff] }
  0x1f   :  { %1230 = vmatpush3.msra.mxu0 %v44_v30  ;;  %v807_v27 = vld [vmem:[%s1812_s5 + $0x18] sm:$0xff]  ;;  %v806_v28 = vld [vmem:[%s1812_s5 + $0x10] sm:$0xff]  ;;  %v804_v30 = vld [vmem:[%s1812_s5] sm:$0xff] }
  0x20   :  { %1231 = vmatprep.subr.mxu0 %v59_v31 }
  0x21   :  { %1232 = vmatpush3.msra.mxu0 %v43_v32 }
  0x22   :  { %140 = vmatmul.mubr.f32.vlgmr.msra.gmra.mxu0 %v1588_v33 }
  0x23   :  { %144 = vmatprep.mubr.f32.mxu0 %v1593_v34 }
  0x26   :  { %145 = vmatmul.mubr.f32.gmra.mxu0 %v1600_v35 }
  0x27   :  { %149 = vmatprep.mubr.f32.mxu0 %v1605_v36 }
  0x2a   :  { %150 = vmatmul.mubr.f32.gmra.mxu0 %v1612_v37 }
  0x2b   :  { %154 = vmatprep.mubr.f32.mxu0 %v1617_v38 }
  0x2e   :  { %155 = vmatmul.mubr.f32.gmra.mxu0 %v1624_v39 }
  0x2f   :  { %159 = vmatprep.mubr.f32.mxu0 %v1629_v40 }
  0x32   :  { %160 = vmatmul.mubr.f32.gmra.mxu0 %v1636_v41 }
  0x33   :  { %164 = vmatprep.mubr.f32.mxu0 %v1641_v42 }
  0x36   :  { %165 = vmatmul.mubr.f32.gmra.mxu0 %v1648_v43 }
  0x37   :  { %169 = vmatprep.mubr.f32.mxu0 %v1653_v44 }
  0x3a   :  { %170 = vmatmul.mubr.f32.gmra.mxu0 %v1660_v45 }
  0x3b   :  { %174 = vmatprep.mubr.f32.mxu0 %v1665_v46 }
  0x3e   :  { %175 = vmatmul.mubr.f32.gmra.mxu0 %v1672_v47 }
  0x3f   :  { %1038 = vmatprep.mubr.f32.mxu0 %v1437_v48 }
  0xe2   :  { %v1233_v49 = vpop.f32.mrf.mxu0 }
  0xe4   :  { %v1234_v50 = vpop.f32.mrf.mxu0 }
  0xe5   :  { %v1235_v63 = vadd.f32 %v1234_v50, %v1233_v49 }
  0xe6   :  { %v1236_v51 = vpop.f32.mrf.mxu0 }
  0xe8   :  { %v1237_v52 = vpop.f32.mrf.mxu0 }
  0xe9   :  { %v1238_v61 = vadd.f32 %v1237_v52, %v1236_v51 }
  0xea   :  { %v1239_v53 = vpop.f32.mrf.mxu0 }
  0xec   :  { %v1240_v54 = vpop.f32.mrf.mxu0 }
  0xed   :  { %v1241_v59 = vadd.f32 %v1240_v54, %v1239_v53 }
  0xee   :  { %v1242_v55 = vpop.f32.mrf.mxu0 }
  0xf0   :  { %v1243_v56 = vpop.f32.mrf.mxu0 }
  0xf1   :  { %v1244_v57 = vadd.f32 %v1243_v56, %v1242_v55  ;;  %v949_v55 = vld [vmem:[%s1813_s6 + $0x18] sm:$0xff]  ;;  %v948_v56 = vld [vmem:[%s1813_s6 + $0x10] sm:$0xff] }
  0xf2   :  { %v1245_v58 = vpop.f32.mrf.mxu0  ;;  %1002 = vmatprep.subr.mxu0 %v949_v55 }
  0xf3   :  { %1288 = vmatpush3.msra.mxu1 %v1244_v57  ;;  %1003 = vmatpush1.msra.mxu0 %v948_v56 }
  0xf4   :  { %v1246_v60 = vpop.f32.mrf.mxu0  ;;  %1289 = vmatprep.subr.mxu1 %v1437_v48 }
  0xf5   :  { %1290 = vmatpush3.msra.mxu1 %v1241_v59  ;;  %v1247_v9 = vadd.f32 %v1246_v60, %v1245_v58 }
  0xf6   :  { %v1248_v62 = vpop.f32.mrf.mxu0  ;;  %1291 = vmatprep.subr.mxu1 %v1437_v48 }
  0xf7   :  { %1292 = vmatpush3.msra.mxu1 %v1238_v61 }
  0xf8   :  { %v1249_v1 = vpop.f32.mrf.mxu0  ;;  %1293 = vmatprep.subr.mxu1 %v1437_v48 }
  0xf9   :  { %1294 = vmatpush3.msra.mxu1 %v1235_v63  ;;  %v1250_v8 = vadd.f32 %v1249_v1, %v1248_v62 }
  0xfa   :  { %v1251_v2 = vpop.f32.mrf.mxu0  ;;  %1296 = vmatmul.mubr.msk.f32.vlgmr.msra.gmra.mxu1 %vm181_vm1, %v180_v0  ;;  %1298 = vmatprep.subr.mxu1 %v1437_v48 }
  0xfb   :  { %1306 = vmatprep.mubr.msk.f32.mxu1 %vm1438_vm0, %v1437_v48 }
  0xfc   :  { %v1252_v3 = vpop.f32.mrf.mxu0 }
  0xfd   :  { %v1253_v7 = vadd.f32 %v1252_v3, %v1251_v2  ;;  %v947_v2 = vld [vmem:[%s1813_s6 + $0x8] sm:$0xff]  ;;  %v946_v3 = vld [vmem:[%s1813_s6] sm:$0xff]  ;;  %s1440_s6 = smov [#allocation2]  }
  0xfe   :  { %v1254_v4 = vpop.f32.mrf.mxu0  ;;  %1004 = vmatprep.subr.mxu0 %v947_v2 }
  0xff   :  { %1005 = vmatpush1.msra.mxu0 %v946_v3 }
 0x100   :  { %v1255_v5 = vpop.f32.mrf.mxu0 }
 0x101   :  { %v1256_v6 = vadd.f32 %v1255_v5, %v1254_v4 }
 0x103   :  { %1299 = vmatpush3.msra.mxu1 %v1256_v6 }
 0x104   :  { %1300 = vmatprep.subr.mxu1 %v1437_v48 }
 0x105   :  { %1301 = vmatpush3.msra.mxu1 %v1253_v7 }
 0x106   :  { %1302 = vmatprep.subr.mxu1 %v1437_v48 }
 0x107   :  { %1303 = vmatpush3.msra.mxu1 %v1250_v8 }
 0x108   :  { %1304 = vmatprep.subr.mxu1 %v1437_v48 }
 0x109   :  { %1305 = vmatpush3.msra.mxu1 %v1247_v9 }
 0x10a   :  { %1307 = vmatmul.mubr.msk.f32.vlgmr.msra.gmra.mxu1 %vm181_vm1, %v180_v0 }
 0x10b   :  { %1311 = vmatprep.mubr.msk.f32.mxu1 %vm335_vm2, %v327_v10 }
 0x1ba   :  { %v251_v11 = vpop.f32.mrf.mxu1 }
 0x1bb   :  { %v325_v12 = vmax.f32 %v251_v11, 0.0 }
 0x1bc   :  { %v1297_v14 = vpop.f32.mrf.mxu1 }
 0x1bd   :  { %567 = vrot.lane.b32.xlu0 %v325_v12, %s1439_s30  ;;  %1309 = vmatprep.subr.mxu1 %v325_v12 }
 0x1be   :  { %1310 = vmatpush3.msra.mxu1 %v325_v12 }
 0x1bf   :  { %1312 = vmatmul.mubr.msk.f32.vlgmr.msra.gmra.mxu1 %vm335_vm2, %v328_v15 }
 0x1c0   :  { %1314 = vmatprep.mubr.msk.f32.mxu1 %vm335_vm2, %v329_v16 }
 0x1c3   :  { %1315 = vmatmul.mubr.msk.f32.gmra.mxu1 %vm335_vm2, %v330_v17 }
 0x1c4   :  { %1319 = vmatprep.mubr.msk.f32.mxu1 %vm335_vm2, %v327_v10 }
 0x1ca   :  { %v321_v18 = vpop.f32.mrf.mxu1 }
 0x1cb   :  { %v326_v19 = vmax.f32 %v321_v18, 0.0 }
 0x1cc   :  { %v1308_v20 = vpop.f32.mrf.mxu1 }
 0x1cd   :  { %668 = vrot.lane.b32.xlu0 %v326_v19, %s1439_s30  ;;  %1317 = vmatprep.subr.mxu1 %v326_v19  ;;  %s1140_s30 = sshll.u32 %s1440_s6, 4  ;;  %s1141_s30 = int_to_ptr.vmem [resolvable:$true] %s1140_s30 }
 0x1ce   :  { %1318 = vmatpush3.msra.mxu1 %v326_v19  ;;  %s1415_s8 = scalar_lea.vmem %s1141_s30, 2048  ;;  %p1420_p1 = scmp.lt.s32.totalorder %s1141_s30, %s1141_s30 }
 0x1cf   :  { %1320 = vmatmul.mubr.msk.f32.vlgmr.msra.gmra.mxu1 %vm335_vm2, %v328_v15  ;;  %p1416_p0 = scmp.ne.s32.totalorder %s1141_s30, %s1415_s8  ;;  %p1421_p2 = scmp.lt.s32.totalorder %s1415_s8, %s1415_s8 }
 0x1d0   :  { %1322 = vmatprep.mubr.msk.f32.mxu1 %vm335_vm2, %v329_v16 }
 0x1d1   :  { %p1422_p3 = por %p1421_p2, %p1420_p1 }
 0x1d3   :  { %1323 = vmatmul.mubr.msk.f32.gmra.mxu1 %vm335_vm2, %v330_v17  ;;  %p1423_p4 = pnand %p1422_p3, %p1416_p0 }
 0x1d4   :  { %1327 = vmatprep.mubr.msk.f32.mxu1 %vm335_vm2, %v331_v21 }
 0x22f   :  { %v568_v22 = vpop.permute.xlu0 %567 }
 0x230   :  { %1325 = vmatprep.subr.mxu1 %v568_v22 }
 0x231   :  { %1326 = vmatpush3.msra.mxu1 %v568_v22 }
 0x232   :  { %1328 = vmatmul.mubr.msk.f32.vlgmr.msra.gmra.mxu1 %vm335_vm2, %v332_v23 }
 0x233   :  { %1330 = vmatprep.mubr.msk.f32.mxu1 %vm335_vm2, %v333_v24 }
 0x236   :  { %1331 = vmatmul.mubr.msk.f32.gmra.mxu1 %vm335_vm2, %v334_v25 }
 0x237   :  { %1335 = vmatprep.mubr.msk.f32.mxu1 %vm335_vm2, %v331_v21 }
 0x23f   :  { %v669_v26 = vpop.permute.xlu0 %668 }
 0x240   :  { %1333 = vmatprep.subr.mxu1 %v669_v26 }
 0x241   :  { %1334 = vmatpush3.msra.mxu1 %v669_v26 }
 0x242   :  { %1336 = vmatmul.mubr.msk.f32.vlgmr.msra.gmra.mxu1 %vm335_vm2, %v332_v23  ;;  %861 = vmatprep.subr.mxu1 %v807_v27 }
 0x243   :  { %1338 = vmatprep.mubr.msk.f32.mxu1 %vm335_vm2, %v333_v24  ;;  %862 = vmatpush1.msra.mxu1 %v806_v28 }
 0x244   :  { %863 = vmatprep.subr.mxu1 %v805_v29 }
 0x245   :  { %864 = vmatpush1.msra.mxu1 %v804_v30 }
 0x246   :  { %1339 = vmatmul.mubr.msk.f32.gmra.mxu1 %vm335_vm2, %v334_v25  ;;  %1341 = vmatprep.subr.mxu1 %v949_v55 }
 0x247   :  { %897 = vmatprep.mubr.f32.mxu1 %v1437_v48 }
 0x27f   :  { %v1313_v31 = vpop.f32.mrf.mxu1 }
 0x280   :  { %v1162_v32 = vmul.f32 -1.442695, %v1313_v31 }
 0x281   :  { %v414_v49 = vpop.f32.mrf.mxu1 }
 0x282   :  { %1351 = vpow2.f32 %v1162_v32  ;;  %v1161_v50 = vmul.f32 -1.442695, %v414_v49 }
 0x283   :  { %v1316_v51 = vpop.f32.mrf.mxu1 }
 0x284   :  { %1353 = vpow2.f32 %v1161_v50  ;;  %v1164_v53 = vmul.f32 -1.442695, %v1316_v51 }
 0x285   :  { %v424_v52 = vpop.f32.mrf.mxu1 }
 0x286   :  { %v1163_v54 = vmul.f32 -1.442695, %v424_v52 }
 0x288   :  { %1355 = vpow2.f32 %v1163_v54 }
 0x289   :  { %1357 = vpow2.f32 %v1164_v53 }
 0x28f   :  { %v1352_v57 = vpop.eup %1351  ;;  %v1321_v58 = vpop.f32.mrf.mxu1 }
 0x290   :  { %v1166_v59 = vmul.f32 -1.442695, %v1321_v58  ;;  %v543_v62 = vadd.f32 1.0, %v1352_v57 }
 0x291   :  { %v1354_v60 = vpop.eup %1353  ;;  %v499_v61 = vpop.f32.mrf.mxu1 }
 0x292   :  { %v542_v63 = vadd.f32 1.0, %v1354_v60  ;;  %v1165_v0 = vmul.f32 -1.442695, %v499_v61  ;;  %1359 = vpow2.f32 %v1166_v59 }
 0x293   :  { %v1324_v1 = vpop.f32.mrf.mxu1 }
 0x294   :  { %1361 = vrcp.f32 %v542_v63  ;;  %v1168_v9 = vmul.f32 -1.442695, %v1324_v1 }
 0x295   :  { %v1356_v4 = vpop.eup %1355  ;;  %1363 = vpow2.f32 %v1165_v0  ;;  %v509_v5 = vpop.f32.mrf.mxu1 }
 0x296   :  { %1365 = vrcp.f32 %v543_v62  ;;  %v544_v6 = vadd.f32 1.0, %v1356_v4  ;;  %v1167_v7 = vmul.f32 -1.442695, %v509_v5  ;;  %v1358_v8 = vpop.eup %1357 }
 0x297   :  { %v545_v10 = vadd.f32 1.0, %v1358_v8 }
 0x298   :  { %1367 = vpow2.f32 %v1167_v7 }
 0x299   :  { %1369 = vrcp.f32 %v544_v6 }
 0x29a   :  { %1371 = vpow2.f32 %v1168_v9 }
 0x29b   :  { %1373 = vrcp.f32 %v545_v10 }
 0x29f   :  { %v1360_v11 = vpop.eup %1359 }
 0x2a0   :  { %v547_v16 = vadd.f32 1.0, %v1360_v11 }
 0x2a1   :  { %v1362_v12 = vpop.eup %1361 }
 0x2a2   :  { %v1364_v14 = vpop.eup %1363  ;;  %1185 = vmatmul.mubr.msk.f32.vlgmr.msra.gmra.mxu1 %vm808_vm3, %v1362_v12 }
 0x2a3   :  { %v1366_v15 = vpop.eup %1365  ;;  %v546_v17 = vadd.f32 1.0, %v1364_v14  ;;  %903 = vmatprep.mubr.f32.mxu1 %v1437_v48  ;;  %1343 = vmatpush1.msra.mxu1 %v948_v56 }
 0x2a4   :  { %1342 = vmatprep.subr.mxu1 %v947_v2 }
 0x2a5   :  { %1375 = vrcp.f32 %v546_v17  ;;  %1344 = vmatpush1.msra.mxu1 %v946_v3  ;;  %v1368_v18 = vpop.eup %1367 }
 0x2a6   :  { %1186 = vmatmul.mubr.msk.f32.gmra.mxu1 %vm808_vm3, %v1366_v15  ;;  %v1370_v19 = vpop.eup %1369  ;;  %1377 = vrcp.f32 %v547_v16  ;;  %v548_v20 = vadd.f32 1.0, %v1368_v18 }
 0x2a7   :  { %909 = vmatprep.mubr.f32.mxu1 %v1437_v48  ;;  %v1372_v21 = vpop.eup %1371 }
 0x2a8   :  { %v1374_v22 = vpop.eup %1373  ;;  %v549_v23 = vadd.f32 1.0, %v1372_v21  ;;  %1379 = vrcp.f32 %v548_v20 }
 0x2aa   :  { %1187 = vmatmul.mubr.msk.f32.gmra.mxu1 %vm808_vm3, %v1370_v19  ;;  %1381 = vrcp.f32 %v549_v23 }
 0x2ab   :  { %915 = vmatprep.mubr.f32.mxu1 %v1437_v48 }
 0x2ae   :  { %1188 = vmatmul.mubr.msk.f32.gmra.mxu1 %vm808_vm3, %v1374_v22 }
 0x2af   :  { %921 = vmatprep.mubr.f32.mxu1 %v1437_v48 }
 0x2b2   :  { %v1376_v24 = vpop.eup %1375 }
 0x2b3   :  { %1189 = vmatmul.mubr.msk.f32.gmra.mxu1 %vm808_vm3, %v1376_v24  ;;  %v1378_v25 = vpop.eup %1377 }
 0x2b4   :  { %927 = vmatprep.mubr.f32.mxu1 %v1437_v48 }
 0x2b5   :  { %v1380_v26 = vpop.eup %1379 }
 0x2b7   :  { %1190 = vmatmul.mubr.msk.f32.gmra.mxu1 %vm808_vm3, %v1378_v25  ;;  %v1382_v27 = vpop.eup %1381 }
 0x2b8   :  { %933 = vmatprep.mubr.f32.mxu1 %v1437_v48 }
 0x2bb   :  { %1191 = vmatmul.mubr.msk.f32.gmra.mxu1 %vm808_vm3, %v1380_v26 }
 0x2bc   :  { %939 = vmatprep.mubr.f32.mxu1 %v1437_v48 }
 0x2bf   :  { %1192 = vmatmul.mubr.msk.f32.gmra.mxu1 %vm808_vm3, %v1382_v27 }
 0x2c0   :  { %1080 = vmatprep.mubr.f32.mxu1 %v1437_v48 }
 0x2f2   :  { %v1329_v28 = vpop.f32.mrf.mxu1 }
 0x2f3   :  { %v1178_v29 = vmul.f32 -1.442695, %v1329_v28 }
 0x2f4   :  { %v648_v30 = vpop.f32.mrf.mxu1 }
 0x2f5   :  { %v1177_v31 = vmul.f32 -1.442695, %v648_v30  ;;  %1383 = vpow2.f32 %v1178_v29 }
 0x2f6   :  { %v1332_v32 = vpop.f32.mrf.mxu1 }
 0x2f7   :  { %1385 = vpow2.f32 %v1177_v31  ;;  %v1180_v51 = vmul.f32 -1.442695, %v1332_v32 }
 0x2f8   :  { %v658_v49 = vpop.f32.mrf.mxu1 }
 0x2f9   :  { %v1179_v50 = vmul.f32 -1.442695, %v658_v49 }
 0x2fb   :  { %1387 = vpow2.f32 %v1179_v50 }
 0x2fc   :  { %1389 = vpow2.f32 %v1180_v51 }
 0x302   :  { %v1337_v52 = vpop.f32.mrf.mxu1  ;;  %v1384_v53 = vpop.eup %1383 }
 0x303   :  { %v1182_v54 = vmul.f32 -1.442695, %v1337_v52  ;;  %v781_v60 = vadd.f32 1.0, %v1384_v53 }
 0x304   :  { %v1386_v55 = vpop.eup %1385  ;;  %v737_v56 = vpop.f32.mrf.mxu1 }
 0x305   :  { %v780_v57 = vadd.f32 1.0, %v1386_v55  ;;  %v1181_v58 = vmul.f32 -1.442695, %v737_v56  ;;  %1391 = vpow2.f32 %v1182_v54 }
 0x306   :  { %v1340_v59 = vpop.f32.mrf.mxu1 }
 0x307   :  { %1393 = vrcp.f32 %v780_v57  ;;  %v1184_v61 = vmul.f32 -1.442695, %v1340_v59 }
 0x308   :  { %v1388_v62 = vpop.eup %1387  ;;  %1395 = vpow2.f32 %v1181_v58  ;;  %v747_v63 = vpop.f32.mrf.mxu1 }
 0x309   :  { %v1183_v0 = vmul.f32 -1.442695, %v747_v63  ;;  %1397 = vpow2.f32 %v1184_v61  ;;  %v782_v1 = vadd.f32 1.0, %v1388_v62  ;;  %v1390_v2 = vpop.eup %1389 }
 0x30a   :  { %1399 = vrcp.f32 %v781_v60  ;;  %v783_v3 = vadd.f32 1.0, %v1390_v2 }
 0x30b   :  { %1401 = vpow2.f32 %v1183_v0 }
 0x30c   :  { %1403 = vrcp.f32 %v782_v1 }
 0x30d   :  { %1405 = vrcp.f32 %v783_v3 }
 0x312   :  { %v1392_v4 = vpop.eup %1391 }
 0x313   :  { %v785_v10 = vadd.f32 1.0, %v1392_v4 }
 0x314   :  { %v1394_v5 = vpop.eup %1393 }
 0x315   :  { %v1396_v6 = vpop.eup %1395  ;;  %1193 = vmatmul.mubr.msk.f32.vlgmr.msra.gmra.mxu0 %vm808_vm3, %v1394_v5 }
 0x316   :  { %v784_v7 = vadd.f32 1.0, %v1396_v6  ;;  %1044 = vmatprep.mubr.f32.mxu0 %v1437_v48  ;;  %v1398_v8 = vpop.eup %1397 }
 0x317   :  { %v1400_v9 = vpop.eup %1399  ;;  %v787_v11 = vadd.f32 1.0, %v1398_v8 }
 0x318   :  { %1407 = vrcp.f32 %v784_v7  ;;  %v1402_v12 = vpop.eup %1401 }
 0x319   :  { %1194 = vmatmul.mubr.msk.f32.gmra.mxu0 %vm808_vm3, %v1400_v9  ;;  %1409 = vrcp.f32 %v787_v11  ;;  %v1404_v14 = vpop.eup %1403  ;;  %v786_v15 = vadd.f32 1.0, %v1402_v12 }
 0x31a   :  { %1050 = vmatprep.mubr.f32.mxu0 %v1437_v48  ;;  %1411 = vrcp.f32 %v785_v10  ;;  %v1406_v16 = vpop.eup %1405 }
 0x31b   :  { %1413 = vrcp.f32 %v786_v15 }
 0x31d   :  { %1195 = vmatmul.mubr.msk.f32.gmra.mxu0 %vm808_vm3, %v1404_v14 }
 0x31e   :  { %1056 = vmatprep.mubr.f32.mxu0 %v1437_v48 }
 0x321   :  { %1196 = vmatmul.mubr.msk.f32.gmra.mxu0 %vm808_vm3, %v1406_v16 }
 0x322   :  { %1062 = vmatprep.mubr.f32.mxu0 %v1437_v48 }
 0x325   :  { %v1408_v17 = vpop.eup %1407 }
 0x326   :  { %1197 = vmatmul.mubr.msk.f32.gmra.mxu0 %vm808_vm3, %v1408_v17  ;;  %v1410_v18 = vpop.eup %1409 }
 0x327   :  { %1068 = vmatprep.mubr.f32.mxu0 %v1437_v48  ;;  %1200 = vmatmul.mubr.msk.f32.vlgmr.msra.gmra.mxu1 %vm808_vm3, %v1410_v18  ;;  %v1412_v19 = vpop.eup %1411 }
 0x328   :  { %v1414_v20 = vpop.eup %1413 }
 0x32a   :  { %1198 = vmatmul.mubr.msk.f32.gmra.mxu0 %vm808_vm3, %v1412_v19 }
 0x32b   :  { %1074 = vmatprep.mubr.f32.mxu0 %v1437_v48 }
 0x32e   :  { %1199 = vmatmul.mubr.msk.f32.gmra.mxu0 %vm808_vm3, %v1414_v20 }
 0x362   :  { %v899_v21 = vpop.f32.mrf.mxu1 }
 0x364   :  { %v901_v22 = vpop.f32.mrf.mxu1 }
 0x366   :  { %v905_v23 = vpop.f32.mrf.mxu1 }
 0x368   :  { %v907_v24 = vpop.f32.mrf.mxu1 }
 0x36a   :  { %v911_v25 = vpop.f32.mrf.mxu1 }
 0x36c   :  { %v913_v26 = vpop.f32.mrf.mxu1 }
 0x36e   :  { %v917_v27 = vpop.f32.mrf.mxu1 }
 0x370   :  { %v919_v28 = vpop.f32.mrf.mxu1 }
 0x373   :  { %v923_v29 = vpop.f32.mrf.mxu1 }
 0x375   :  { %v925_v30 = vpop.f32.mrf.mxu1 }
 0x377   :  { %v929_v31 = vpop.f32.mrf.mxu1 }
 0x379   :  { %v931_v49 = vpop.f32.mrf.mxu1 }
 0x37b   :  { %v935_v54 = vpop.f32.mrf.mxu1 }
 0x37d   :  { %v937_v61 = vpop.f32.mrf.mxu1 }
 0x37f   :  { %v941_v3 = vpop.f32.mrf.mxu1 }
 0x381   :  { %v943_v7 = vpop.f32.mrf.mxu1 }
 0x3d5   :  { %v1040_v32 = vpop.f32.mrf.mxu0 }
 0x3d6   :  { %v1087_v50 = vmul.f32 %v1040_v32, %v899_v21 }
 0x3d7   :  { %v1042_v51 = vpop.f32.mrf.mxu0 }
 0x3d8   :  { %v1103_v48 = vmul.f32 %v1087_v50, %v1588_v33  ;;  %v1088_v52 = vmul.f32 %v1042_v51, %v901_v22 }
 0x3d9   :  { %v1046_v53 = vpop.f32.mrf.mxu0 }
 0x3da   :  { %1119 = vst [vmem:[#allocation2] sm:$0xff] %v1103_v48  ;;  %v1104_v55 = vmul.f32 %v1088_v52, %v1525_v13  ;;  %v1089_v56 = vmul.f32 %v1046_v53, %v905_v23 }
 0x3db   :  { %v1048_v57 = vpop.f32.mrf.mxu0 }
 0x3dc   :  { %1120 = vst [vmem:[#allocation2 + $0x8] sm:$0xff] %v1104_v55  ;;  %v1105_v58 = vmul.f32 %v1089_v56, %v1600_v35  ;;  %v1090_v59 = vmul.f32 %v1048_v57, %v907_v24 }
 0x3dd   :  { %v1052_v60 = vpop.f32.mrf.mxu0 }
 0x3de   :  { %1121 = vst [vmem:[#allocation2 + $0x10] sm:$0xff] %v1105_v58  ;;  %v1106_v62 = vmul.f32 %v1090_v59, %v1593_v34  ;;  %v1091_v63 = vmul.f32 %v1052_v60, %v911_v25 }
 0x3df   :  { %v1054_v0 = vpop.f32.mrf.mxu0 }
 0x3e0   :  { %1122 = vst [vmem:[#allocation2 + $0x18] sm:$0xff] %v1106_v62  ;;  %v1107_v33 = vmul.f32 %v1091_v63, %v1612_v37  ;;  %v1092_v1 = vmul.f32 %v1054_v0, %v913_v26 }
 0x3e1   :  { %v1058_v2 = vpop.f32.mrf.mxu0 }
 0x3e2   :  { %1123 = vst [vmem:[#allocation2 + $0x20] sm:$0xff] %v1107_v33  ;;  %v1108_v13 = vmul.f32 %v1092_v1, %v1605_v36  ;;  %v1093_v4 = vmul.f32 %v1058_v2, %v917_v27 }
 0x3e3   :  { %v1060_v5 = vpop.f32.mrf.mxu0 }
 0x3e4   :  { %1124 = vst [vmem:[#allocation2 + $0x28] sm:$0xff] %v1108_v13  ;;  %v1109_v35 = vmul.f32 %v1093_v4, %v1624_v39  ;;  %v1094_v6 = vmul.f32 %v1060_v5, %v919_v28 }
 0x3e6   :  { %1125 = vst [vmem:[#allocation2 + $0x30] sm:$0xff] %v1109_v35  ;;  %v1110_v34 = vmul.f32 %v1094_v6, %v1617_v38  ;;  %v1064_v8 = vpop.f32.mrf.mxu0 }
 0x3e7   :  { %v1095_v9 = vmul.f32 %v1064_v8, %v923_v29  ;;  %v1082_v10 = vpop.f32.mrf.mxu1 }
 0x3e8   :  { %1126 = vst [vmem:[#allocation2 + $0x38] sm:$0xff] %v1110_v34  ;;  %v1066_v37 = vpop.f32.mrf.mxu0  ;;  %v1101_v14 = vmul.f32 %v1082_v10, %v941_v3 }
 0x3e9   :  { %v1111_v11 = vmul.f32 %v1095_v9, %v1636_v41  ;;  %v1096_v12 = vmul.f32 %v1066_v37, %v925_v30  ;;  %v1084_v15 = vpop.f32.mrf.mxu1 }
 0x3ea   :  { %v1070_v36 = vpop.f32.mrf.mxu0  ;;  %v1117_v39 = vmul.f32 %v1101_v14, %v1672_v47  ;;  %v1102_v18 = vmul.f32 %v1084_v15, %v943_v7 }
 0x3eb   :  { %1127 = vst [vmem:[#allocation2 + $0x40] sm:$0xff] %v1111_v11  ;;  %v1112_v16 = vmul.f32 %v1096_v12, %v1629_v40  ;;  %v1097_v17 = vmul.f32 %v1070_v36, %v929_v31 }
 0x3ec   :  { %v1072_v19 = vpop.f32.mrf.mxu0  ;;  %1133 = vst [vmem:[#allocation2 + $0x70] sm:$0xff] %v1117_v39  ;;  %v1118_v20 = vmul.f32 %v1102_v18, %v1665_v46 }
 0x3ed   :  { %1128 = vst [vmem:[#allocation2 + $0x48] sm:$0xff] %v1112_v16  ;;  %v1113_v38 = vmul.f32 %v1097_v17, %v1648_v43  ;;  %v1098_v21 = vmul.f32 %v1072_v19, %v931_v49 }
 0x3ee   :  { %v1076_v41 = vpop.f32.mrf.mxu0  ;;  %1134 = vst [vmem:[#allocation2 + $0x78] sm:$0xff] %v1118_v20 }
 0x3ef   :  { %1129 = vst [vmem:[#allocation2 + $0x50] sm:$0xff] %v1113_v38  ;;  %v1114_v22 = vmul.f32 %v1098_v21, %v1641_v42  ;;  %v1099_v23 = vmul.f32 %v1076_v41, %v935_v54 }
 0x3f0   :  { %v1078_v40 = vpop.f32.mrf.mxu0 }
 0x3f1   :  { %1130 = vst [vmem:[#allocation2 + $0x58] sm:$0xff] %v1114_v22  ;;  %v1115_v47 = vmul.f32 %v1099_v23, %v1660_v45  ;;  %v1100_v24 = vmul.f32 %v1078_v40, %v937_v61 }
 0x3f3   :  { %1131 = vst [vmem:[#allocation2 + $0x60] sm:$0xff] %v1115_v47  ;;  %v1116_v43 = vmul.f32 %v1100_v24, %v1653_v44 }
 0x3f5   :  { %1132 = vst [vmem:[#allocation2 + $0x68] sm:$0xff] %v1116_v43 }
 0x3f6   :  { %1426 = shalt.err (!%p1423_p4)
}
 0x3f7   :  { %s1441_s9 = smov 256   ;;  %s1442_s10 = smov 16  }
 0x3f8   :  { %1146 = dma.vmem_to_hbm [thread:$0]  %s1141_s30, 2048, %s1814_s7, [#allocation3], %s1441_s9, %s1441_s9, %s1442_s10  }
 0x3f9   :  { %1435 = dma.done.wait [#allocation3], 2048  }
 0x3fa   :  { %1436 = vsyncadd [#allocation3], 4294965248 }
 0x3fb   :  { %1150 = vsyncpa [#allocation3], 1 }

</bundles_post_ra>
